<compile_context>
chip_gen: v7x
topology: tpu7x:2x2x1
jax: 0.10.0
libtpu: 0.0.40
codegen_flags: <defaults>
</compile_context>

<pallas_src>
import jax
import jax.numpy as jnp
from jax.experimental import pallas as pl
from jax.experimental.pallas import tpu as pltpu

_LANE = 128      # lane width: last-dim tiling unit
_SUBLANE = 8     # sublane width: second-to-last-dim tiling unit
_MXU_N = 256     # v6e/v7x MXU width (also fine on v5e)


def _round_up(x, m):
    return (x + m - 1) // m * m


def _vmem_capacity_bytes():
    try:
        return int(pltpu.get_tpu_info().vmem_capacity_bytes)
    except Exception:
        return 64 << 20          # conservative: v7x per-TensorCore VMEM


# --------------------------- kernels ----------------------------------------

def _linear_kernel_resident(x_ref, w_ref, b_ref, o_ref):
    # Whole K resident in VMEM: one uninterrupted MXU sweep per (i, j) tile,
    # bias fused into the single store.
    acc = jnp.dot(x_ref[...], w_ref[...], preferred_element_type=jnp.float32)
    o_ref[...] = (acc + b_ref[...].astype(jnp.float32)).astype(o_ref.dtype)


def _linear_kernel_ktiled_f32out(x_ref, w_ref, b_ref, o_ref):
    # K-tiled, f32 output: accumulate directly into the VMEM-resident output
    # tile (no scratch copy, no finalize pass).
    k = pl.program_id(2)

    @pl.when(k == 0)
    def _():
        o_ref[...] = jnp.zeros_like(o_ref) + b_ref[...].astype(o_ref.dtype)

    o_ref[...] += jnp.dot(x_ref[...], w_ref[...],
                          preferred_element_type=jnp.float32)


def _linear_kernel_ktiled_acc(x_ref, w_ref, b_ref, o_ref, acc_ref):
    # K-tiled, narrow (non-f32) output: f32 scratch accumulator.
    k = pl.program_id(2)

    @pl.when(k == 0)
    def _():
        acc_ref[...] = jnp.zeros_like(acc_ref)

    acc_ref[...] += jnp.dot(x_ref[...], w_ref[...],
                            preferred_element_type=jnp.float32)

    @pl.when(k == pl.num_programs(2) - 1)
    def _():
        o_ref[...] = (acc_ref[...] + b_ref[...].astype(jnp.float32)
                      ).astype(o_ref.dtype)


# --------------------------- parameter prep (load-time, once) ---------------

def prepare_linear_params(weight, bias, *, use_bf16=True, k_tile_threshold=2048):
    """One-time parameter prep — NOT per forward call.

    * Transposes W to (n_in, n_out): plain [M,K]x[K,N] MXU dot, lane-dense
      weight DMA along the output dim, no per-step RHS relayout.
    * Pads n_out to a multiple of 256 (full MXU width, unmasked stores).
    * Pads n_in to a multiple of 128 only when it is large enough to ever need
      K-grid tiling (block == full dim is always legal for small K).
    * Casts W to bf16 once (default fast path); kernels accumulate in f32.
    """
    n_out, n_in = weight.shape
    n_out_p = _round_up(n_out, _MXU_N)
    n_in_p = _round_up(n_in, _LANE) if n_in > k_tile_threshold else n_in
    w = jnp.pad(weight.T, ((0, n_in_p - n_in), (0, n_out_p - n_out)))
    if use_bf16:
        w = w.astype(jnp.bfloat16)
    b = jnp.pad(bias, (0, n_out_p - n_out)).astype(jnp.float32).reshape(1, n_out_p)
    return w, b


# --------------------------- forward -----------------------------------------

def _footprint(tile_m, tile_k, tile_n, in_itemsize, out_itemsize, with_acc):
    f = 2 * (tile_m * tile_k * in_itemsize      # x tile (double-buffered)
             + tile_k * tile_n * in_itemsize    # W tile
             + tile_m * tile_n * out_itemsize   # o tile
             + tile_n * 4)                      # bias row
    if with_acc:
        f += tile_m * tile_n * 4                # f32 accumulator scratch
    return f


def _pick_tile_n(n_out_p, max_tile_n):
    cap = min(max_tile_n, n_out_p)
    for step in (_MXU_N, _LANE):                # prefer 256-wide, then 128
        cand = (cap // step) * step
        while cand >= step:
            if n_out_p % cand == 0:
                return cand
            cand -= step
    return _LANE


def linear_forward(x, w_prepped, b_prepped, n_out, *,
                   max_tile_m=512, max_tile_n=512, max_tile_k=2048):
    """y = x @ W.T + b with (W, b) from prepare_linear_params.

    x: (B, n_in) -> (B, n_out) in x.dtype; MXU runs in w_prepped.dtype
    (bf16 by default) with f32 accumulation.
    """
    B, n_in = x.shape
    n_in_p, n_out_p = w_prepped.shape
    compute_dtype = w_prepped.dtype
    out_dtype = x.dtype
    in_itemsize = jnp.dtype(compute_dtype).itemsize
    out_itemsize = jnp.dtype(out_dtype).itemsize
    out_is_f32 = out_dtype == jnp.float32

    # ---- generation-aware VMEM budgets -------------------------------------
    vmem_cap = _vmem_capacity_bytes()           # 128 MiB v5e/v6e, 64 MiB v7x
    tile_budget = vmem_cap // 2                 # leave head-room for pipelining
    vmem_limit = max(32 << 20, min(int(vmem_cap * 0.85), vmem_cap - (4 << 20)))

    # ---- tile selection (multiples of the (8, 128) vreg tile) --------------
    tile_n = _pick_tile_n(n_out_p, max_tile_n)
    B8 = _round_up(B, _SUBLANE)

    def pick_m(tile_k, with_acc):
        tm = min(B8, max_tile_m)
        while tm > _SUBLANE and _footprint(tm, tile_k, tile_n, in_itemsize,
                                           out_itemsize, with_acc) > tile_budget:
            tm = max(_SUBLANE, _round_up(tm // 2, _SUBLANE))
        return tm

    # Prefer whole-K residency: drop the K grid axis, no accumulator
    # round-trip, W streamed from HBM exactly once per N sweep.
    if _footprint(_SUBLANE, n_in_p, tile_n, in_itemsize, out_itemsize,
                  False) <= tile_budget:
        tile_k, k_tiled = n_in_p, False
        tile_m = pick_m(tile_k, with_acc=False)
    else:
        if n_in_p % _LANE == 0:
            tile_k = _LANE
            cand = (min(max_tile_k, n_in_p) // _LANE) * _LANE
            while cand >= _LANE:
                if n_in_p % cand == 0:
                    tile_k = cand
                    break
                cand -= _LANE
        else:
            tile_k = n_in_p                     # block == full dim is legal
        k_tiled = tile_k < n_in_p
        tile_m = pick_m(tile_k, with_acc=k_tiled and not out_is_f32)

    # v7x megacore: guarantee >= 2 parallel grid iterations when possible so
    # both TensorCores get work (split N first, then M).
    if (n_out_p // tile_n) * pl.cdiv(B8, tile_m) < 2:
        half_n = ((tile_n // 2) // _LANE) * _LANE
        if half_n >= _LANE and n_out_p % half_n == 0:
            tile_n = half_n
        elif tile_m > _SUBLANE:
            tile_m = max(_SUBLANE, _round_up(tile_m // 2, _SUBLANE))

    B_p = _round_up(B, tile_m)
    grid_m, grid_n, grid_k = B_p // tile_m, n_out_p // tile_n, n_in_p // tile_k

    # ---- per-call input prep (x only; W/b were prepped once) ---------------
    x_in = x if x.dtype == compute_dtype else x.astype(compute_dtype)
    pad_b, pad_k = B_p - B, n_in_p - n_in
    if pad_b or pad_k:                          # skipped in the common case
        x_in = jnp.pad(x_in, ((0, pad_b), (0, pad_k)))

    x_bytes = B_p * n_in_p * in_itemsize
    w_bytes = n_in_p * n_out_p * in_itemsize
    cost = pl.CostEstimate(
        flops=2 * B_p * n_in_p * n_out_p,
        transcendentals=0,
        bytes_accessed=(grid_n * x_bytes + grid_m * w_bytes
                        + grid_m * n_out_p * 4
                        + B_p * n_out_p * out_itemsize),
    )

    if not k_tiled:
        kernel = _linear_kernel_resident
        grid = (grid_m, grid_n)
        in_specs = [
            pl.BlockSpec((tile_m, tile_k), lambda i, j: (i, 0)),
            pl.BlockSpec((tile_k, tile_n), lambda i, j: (0, j)),
            pl.BlockSpec((1, tile_n), lambda i, j: (0, j)),
        ]
        out_spec = pl.BlockSpec((tile_m, tile_n), lambda i, j: (i, j))
        scratch = []
        dims = ("parallel", "parallel")
    else:
        grid = (grid_m, grid_n, grid_k)
        in_specs = [
            pl.BlockSpec((tile_m, tile_k), lambda i, j, k: (i, k)),
            pl.BlockSpec((tile_k, tile_n), lambda i, j, k: (k, j)),
            pl.BlockSpec((1, tile_n), lambda i, j, k: (0, j)),
        ]
        out_spec = pl.BlockSpec((tile_m, tile_n), lambda i, j, k: (i, j))
        dims = ("parallel", "parallel", "arbitrary")
        if out_is_f32:
            kernel = _linear_kernel_ktiled_f32out
            scratch = []
        else:
            kernel = _linear_kernel_ktiled_acc
            scratch = [pltpu.VMEM((tile_m, tile_n), jnp.float32)]

    out = pl.pallas_call(
        kernel,
        out_shape=jax.ShapeDtypeStruct((B_p, n_out_p), out_dtype),
        grid_spec=pltpu.PrefetchScalarGridSpec(
            num_scalar_prefetch=0,
            grid=grid,
            in_specs=in_specs,
            out_specs=out_spec,
            scratch_shapes=scratch,
        ),
        compiler_params=pltpu.CompilerParams(
            dimension_semantics=dims,
            vmem_limit_bytes=vmem_limit,
        ),
        cost_estimate=cost,
    )(x_in, w_prepped, b_prepped)

    return out[:B, :n_out]


# --------------------------- demo / correctness check ------------------------

if __name__ == "__main__":
    # Small shapes consistent with the module: batch=8, n_in=32, n_out=16.
    B, n_in, n_out = 8, 32, 16

    key = jax.random.PRNGKey(0)
    kx, kw, kb = jax.random.split(key, 3)

    # Deterministic init mimicking nn.Linear: U(-1/sqrt(n_in), 1/sqrt(n_in))
    bound = 1.0 / jnp.sqrt(jnp.float32(n_in))
    weight = jax.random.uniform(kw, (n_out, n_in), jnp.float32, -bound, bound)
    bias = jax.random.uniform(kb, (n_out,), jnp.float32, -bound, bound)
    x = jax.random.normal(kx, (B, n_in), jnp.float32)

    y_ref = x @ weight.T + bias

    # --- default fast path: bf16 weights/activations, f32 accumulation ------
    w_bf16, b_p = prepare_linear_params(weight, bias)          # use_bf16=True
    y_fast = jax.block_until_ready(linear_forward(x, w_bf16, b_p, n_out))
    assert y_fast.shape == (B, n_out)
    assert jnp.allclose(y_fast, y_ref, atol=3e-2, rtol=3e-2), \
        "bf16 fast path mismatch vs reference"

    # --- full-precision path: bit-for-bit-level agreement with nn.Linear ----
    w_f32, b_p32 = prepare_linear_params(weight, bias, use_bf16=False)
    y_f32 = jax.block_until_ready(linear_forward(x, w_f32, b_p32, n_out))
    assert jnp.allclose(y_f32, y_ref, atol=1e-5, rtol=1e-5), \
        "f32 path mismatch vs reference"

    print("KERNEL_OK")
</pallas_src>

<mosaic_0001>
module attributes {stable_mosaic.version = 11 : i64} {
  func.func @_linear_kernel_resident(%arg0: i32, %arg1: i32, %arg2: memref<8x32xbf16, #tpu.memory_space<vmem>>, %arg3: memref<32x128xbf16, #tpu.memory_space<vmem>>, %arg4: memref<1x128xf32, #tpu.memory_space<vmem>>, %arg5: memref<8x128xf32, #tpu.memory_space<vmem>>) attributes {dimension_semantics = [#tpu.dimension_semantics<parallel>, #tpu.dimension_semantics<parallel>], iteration_bounds = array<i64: 1, 2>, scalar_prefetch = 0 : i64, scratch_operands = 0 : i64, tpu.core_type = #tpu.core_type<tc>, window_params = [{transform_indices = @transform_0, window_bounds = array<i64: 8, 32>}, {transform_indices = @transform_1, window_bounds = array<i64: 32, 128>}, {transform_indices = @transform_2, window_bounds = array<i64: 1, 128>}, {transform_indices = @transform_3, window_bounds = array<i64: 8, 128>}]} {
    %c0 = arith.constant 0 : index
    %c0_0 = arith.constant 0 : index
    %0 = vector.load %arg2[%c0, %c0_0] : memref<8x32xbf16, #tpu.memory_space<vmem>>, vector<8x32xbf16>
    %c0_1 = arith.constant 0 : index
    %c0_2 = arith.constant 0 : index
    %1 = vector.load %arg3[%c0_1, %c0_2] : memref<32x128xbf16, #tpu.memory_space<vmem>>, vector<32x128xbf16>
    %cst = arith.constant dense<0.000000e+00> : vector<8x128xf32>
    %2 = tpu.matmul %0, %1, %cst {dimension_numbers = #tpu.dot_dimension_numbers<[1], [0], [0], [1], [0, 0, 1, 1], [], []>} : vector<8x32xbf16>, vector<32x128xbf16>, vector<8x128xf32> -> vector<8x128xf32>
    %c0_3 = arith.constant 0 : index
    %c0_4 = arith.constant 0 : index
    %3 = vector.load %arg4[%c0_3, %c0_4] : memref<1x128xf32, #tpu.memory_space<vmem>>, vector<1x128xf32>
    %4 = vector.broadcast %3 : vector<1x128xf32> to vector<8x128xf32>
    %5 = arith.addf %2, %4 : vector<8x128xf32>
    %c0_5 = arith.constant 0 : index
    %c0_6 = arith.constant 0 : index
    %6 = vector.load %arg5[%c0_5, %c0_6] : memref<8x128xf32, #tpu.memory_space<vmem>>, vector<8x128xf32>
    tpu.vector_store %arg5[%c0_5, %c0_6], %5 {strides = array<i32>} : memref<8x128xf32, #tpu.memory_space<vmem>>, vector<8x128xf32>,
    return
  }
  func.func @transform_0(%arg0: i32, %arg1: i32) -> (i32, i32) {
    %c0_i32 = arith.constant 0 : i32
    %c0_i32_0 = arith.constant 0 : i32
    return %arg0, %c0_i32 : i32, i32
  }
  func.func @transform_1(%arg0: i32, %arg1: i32) -> (i32, i32) {
    %c0_i32 = arith.constant 0 : i32
    %c0_i32_0 = arith.constant 0 : i32
    return %c0_i32, %arg1 : i32, i32
  }
  func.func @transform_2(%arg0: i32, %arg1: i32) -> (i32, i32) {
    %c0_i32 = arith.constant 0 : i32
    %c0_i32_0 = arith.constant 0 : i32
    return %c0_i32, %arg1 : i32, i32
  }
  func.func @transform_3(%arg0: i32, %arg1: i32) -> (i32, i32) {
    %c0_i32 = arith.constant 0 : i32
    return %arg0, %arg1 : i32, i32
  }
}

</mosaic_0001>

<bundles_post_ra>
// kernel: tpu_custom_call.1
= control target key start
LH: loop header
LB: loop body
LE: loop exit
PB: predicated region body
PF: predicated region fallthrough
CT: control target
= control target key end

     0   :  { %8 = vsyncpa [#allocation3], 0  ;;  %s934_s0 = inlined_call_operand.hbm [shape: bf16[8,32], index: 0, kind: input, shape index: {}]   ;;  %s935_s1 = inlined_call_operand.hbm [shape: bf16[32,256], index: 1, kind: input, shape index: {}]   ;;  %s936_s2 = inlined_call_operand.vmem [shape: f32[1,256], index: 2, kind: input, shape index: {}]   ;;  %s937_s3 = inlined_call_operand.hbm [shape: f32[8,256], index: 3, kind: output, shape index: {}]  }
   0x1   :  { %9 = vsyncpa [#allocation6], 0 }
   0x2   :  { %11 = vsyncpa [#allocation6 + $0x1], 0 }
   0x3   :  { %12 = vsyncpa [#allocation4], 0 }
   0x4   :  { %14 = vsyncpa [#allocation4 + $0x1], 0  ;;  %s709_s12 = smov 0   ;;  %s711_s13 = smov 0  }
   0x5   :  { %s713_s14 = smov 0   ;;  %s715_s15 = smov 0  }
   0x6   :  { %s717_s16 = smov 0   ;;  %s719_s17 = smov 0  }
   0x7 LB: > { %s425_s18 = sadd.s32 4294967295, %s679_s17   ;;  %s426_s19 = sadd.s32 4294967294, %s679_s17   ;;  %s679_s17 = sphi %s719_s17, %s20_s17   ;;  %s675_s16 = sphi %s717_s16, %s965_s16   ;;  %s671_s15 = sphi %s715_s15, %s964_s15   ;;  %s667_s14 = sphi %s713_s14, %s963_s14   ;;  %s663_s13 = sphi %s711_s13, %s962_s13   ;;  %s659_s12 = sphi %s709_s12, %s961_s12  }
   0x8   : > { %s65_s20 = sadd.s32 1, %s667_s14  ;;  %p72_p0 = scmp.ne.s32.totalorder %s667_s14, %s663_s13 }
   0x9   : > { %p73_p1 = scmp.eq.s32.totalorder %s679_s17, 0  ;;  %p78_p2 = scmp.ne.s32.totalorder %s663_s13, %s659_s12 }
   0xa   : > { %p747_p3 = scmp.eq.s32.totalorder %s425_s18, 0  ;;  %p130_p4 = scmp.eq.s32.totalorder %s425_s18, 1 }
   0xb   : > { %p751_p5 = por %p73_p1, %p72_p0  ;;  %p136_p6 = scmp.eq.s32.totalorder %s426_s19, 1 }
   0xc   : > { %s944_s21 = scalar_select %p747_p3, 1, 0 }
   0xd   : > { %p757_p7 = por %p747_p3, %p78_p2  ;;  %p761_p8 = por %p130_p4, %p72_p0 }
   0xe   : > { %p765_p9 = por %p136_p6, %p78_p2  ;;  %p427_p10 = scmp.ge.s32.totalorder %s679_s17, 1 }
   0xf   : > { %s946_s23 = scalar_select %p757_p7, 1, 0 }
  0x10   : > { %s947_s24 = scalar_select %p761_p8, 1, 0 }
  0x11   : > { %s948_s25 = scalar_select %p765_p9, 1, 0 }
  0x12   : > { %p143_p11 = scmp.lt.s32.totalorder %s679_s17, 3  ;;  %s681_s27 = smov [#allocation2]  }
  0x13   : > { %s158_s28 = sshll.u32 %s681_s27, 4  ;;  %p476_p1 = scmp.lt.s32.totalorder %s679_s17, 2  ;;  %s159_s28 = int_to_ptr.vmem [resolvable:$true] %s158_s28 }
  0x14   : > { %p772_p13 = pnand %p427_p10, %p143_p11  ;;  %s29_s4 = sadd.s32 1, %s675_s16 }
  0x15   : > { %p781_p4 = pnand %p476_p1, %p751_p5  ;;  %p792_p6 = scmp.ge.s32.totalorder %s29_s4, 2 }
  0x16   : > { %s949_s26 = scalar_select %p772_p13, 1, 0 }
  0x17   : > { %p463_p0 = pneg %p772_p13  ;;  %s169_s6 = sand.u32 1, %s667_s14  }
  0x18   : > { %s950_s29 = scalar_select %p781_p4, 1, 0 }
  0x19   : > { %p787_p2 = pnand %p463_p0, %p747_p3  ;;  %s535_s9 = scalar_lea.hbm %s934_s0, 64 }
  0x1a   : > { %s952_s5 = scalar_select %p792_p6, 1, 0 }
  0x1b   : > { %p536_p5 = scmp.ne.s32.totalorder %s934_s0, %s535_s9  ;;  %p537_p10 = pneg %p787_p2 }
  0x1c   : > { %p542_p0 = scmp.lt.u32.totalorder %s535_s9, %s934_s0 }
  0x1d   : > { %p538_p11 = pnand %p537_p10, %p536_p5 }
  0x1f   : > { %p539_p1 = pneg %p538_p11 }
  0x21   : > { %p544_p12 = pnand %p542_p0, %p539_p1 }
  0x23   : > { %547 = shalt.err (!%p544_p12)
}
  0x24   : > { %s548_s22 = scalar_lea.vmem %s159_s28, 64  ;;  %p556_p3 = scmp.lt.s32.totalorder %s159_s28, %s159_s28 }
  0x25   : > { %p549_p9 = scmp.ne.s32.totalorder %s159_s28, %s548_s22  ;;  %p557_p13 = scmp.lt.s32.totalorder %s548_s22, %s548_s22 }
  0x27   : > { %p551_p8 = pnand %p549_p9, %p537_p10  ;;  %p558_p4 = por %p557_p13, %p556_p3 }
  0x29   : > { %p552_p7 = pneg %p551_p8 }
  0x2b   : > { %p559_p6 = pnand %p558_p4, %p552_p7 }
  0x2d   : > { %562 = shalt.err (!%p559_p6)
}
  0x2e   : > { %466 = dma.hbm_to_vmem [thread:$0]  (!%p787_p2), %s934_s0, 64, %s159_s28, [#allocation3]  }
  0x2f   : > { %p953_p9 = scmp.ne.s32.totalorder %s952_s5, 0  ;;  %s430_s8 = sshll.u32 %s169_s6, 4 }
  0x30   : > { %s431_s10 = sshll.u32 %s675_s16, 6  ;;  %s173_s19 = scalar_lea.vmem [#allocation5], %s430_s8 }
  0x31   : > { %s967_s4 = smov (%p953_p9, %s29_s4), 0  ;;  %s823_s18 = scalar_lea.hbm %s935_s1, %s431_s10 }
  0x32   : > { %s62_s9 = ssub.s32 %s675_s16, %s967_s4  ;;  %s179_s22 = sshll.u32 %s173_s19, 4  ;;  %s830_s22 = int_to_ptr.vmem [resolvable:$true] %s179_s22 }
  0x33   : > { %p63_p3 = scmp.eq.s32.totalorder %s62_s9, 0  ;;  %s832_s5 = scalar_lea.sflag [#allocation6], %s169_s6 }
  0x34   : > { %s563_s27 = scalar_lea.hbm %s823_s18, 256  ;;  %p954_p8 = scmp.ne.s32.totalorder %s950_s29, 0 }
  0x35   : > { %s828_s28 = scalar_select %p63_p3, %s667_s14, %s65_s20  }
  0x36   : > { %p564_p7 = scmp.ne.s32.totalorder %s823_s18, %s563_s27  ;;  %p565_p12 = pneg %p954_p8 }
  0x37   : > { %s568_s8 = scalar_lea.hbm %s935_s1, 512  ;;  %p569_p2 = scmp.lt.u32.totalorder %s823_s18, %s935_s1 }
  0x38   : > { %p566_p13 = pnand %p565_p12, %p564_p7  ;;  %p570_p6 = scmp.lt.u32.totalorder %s568_s8, %s563_s27 }
  0x39   : > { %p572_p10 = scmp.lt.u32.totalorder %s563_s27, %s823_s18 }
  0x3a   : > { %p567_p4 = pneg %p566_p13  ;;  %p571_p5 = por %p570_p6, %p569_p2 }
  0x3c   : > { %p573_p11 = por %p572_p10, %p571_p5 }
  0x3e   : > { %p574_p1 = pnand %p573_p11, %p567_p4 }
  0x40   : > { %577 = shalt.err (!%p574_p1)
}
  0x41   : > { %s578_s20 = scalar_lea.vmem %s830_s22, 256  ;;  %s682_s6 = smov [#allocation5]  }
  0x42   : > { %p579_p0 = scmp.ne.s32.totalorder %s830_s22, %s578_s20  ;;  %s583_s11 = sshll.u32 %s682_s6, 4  ;;  %s584_s11 = int_to_ptr.vmem [resolvable:$false] %s583_s11 }
  0x43   : > { %s585_s19 = scalar_lea.vmem %s584_s11, 512  ;;  %p586_p7 = scmp.lt.s32.totalorder %s830_s22, %s584_s11 }
  0x44   : > { %p581_p9 = pnand %p579_p0, %p565_p12  ;;  %p587_p13 = scmp.lt.s32.totalorder %s585_s19, %s578_s20 }
  0x46   : > { %p582_p3 = pneg %p581_p9  ;;  %p588_p2 = por %p587_p13, %p586_p7 }
  0x48   : > { %p589_p6 = pnand %p588_p2, %p582_p3 }
  0x4a   : > { %592 = shalt.err (!%p589_p6)
}
  0x4b   : > { %s683_s27 = smov 128   ;;  %s684_s7 = smov 64  }
  0x4c   : > { %s685_s9 = smov 4   ;;  %p955_p12 = scmp.ne.s32.totalorder %s949_s26, 0 }
  0x4d   : > { %470 = dma.hbm_to_vmem [thread:$0]  (!%p954_p8), %s823_s18, 256, %s830_s22, %s832_s5, %s683_s27, %s684_s7, %s685_s9  }
  0x4e   : > { %197 = sbr.rel (%p955_p12) target bundleno = 327 (0x147), region = 32  ;;  %p956_p4 = scmp.ne.s32.totalorder (!%p955_p12), %s944_s21, 0 }
  0x55   : > { %646 = dma.done.wait (%p956_p4), [#allocation3], 64  }
  0x56   : > { %648 = vsyncadd (%p956_p4), [#allocation3], 4294967232  ;;  %s867_s8 = sand.u32 1, %s663_s13   ;;  %p957_p5 = scmp.ne.s32.totalorder %s946_s23, 0 }
  0x57   : > { %s434_s10 = sshll.u32 %s867_s8, 4  ;;  %s204_s30 = scalar_lea.sflag [#allocation6], %s867_s8 }
  0x58   : > { %s207_s20 = scalar_lea.vmem [#allocation5], %s434_s10 }
  0x59   : > { %650 = dma.done.wait (%p957_p5), %s204_s30, 256  }
  0x5a   : > { %652 = vsyncadd (%p957_p5), %s204_s30, 4294967040  ;;  %v686_v0 = vmov 0.0   ;;  %vm687_vm0 = vmmov 0   ;;  %v533_v1 = vld [vmem:[%s207_s20] sm:$0xff]   ;;  %v534_v2 = vld [vmem:[%s207_s20 + $0x8] sm:$0xff]   ;;  %vm261_vm1 = vcmask 261120  }
  0x5b   : > { %447 = vmatprep.subr.bf16.mxu0 %v686_v0  ;;  %451 = vmatprep.mubr.msk.bf16.mxu0 %vm687_vm0, %v686_v0  ;;  %v237_v3 = vld [vmem:[#allocation2] sm:$0xf]  ;;  %p233_p8 = scmp.lt.s32.totalorder %s671_s15, 1  ;;  %s435_s23 = sshll.u32 %s867_s8, 3 }
  0x5c   : > { %448 = vmatpush3.bf16.msra.mxu0 %v533_v1  ;;  %s441_s22 = sshll.u32 %s671_s15, 7  ;;  %s232_s5 = scalar_lea.vmem [#allocation7], %s435_s23 }
  0x5d   : > { %449 = vmatprep.subr.bf16.mxu0 %v686_v0  ;;  %s234_s21 = scalar_select %p233_p8, %s671_s15, 1 }
  0x5e   : > { %s322_s6 = sshll.u32 %s232_s5, 4  ;;  %s885_s27 = scalar_lea.hbm %s937_s3, %s441_s22  ;;  %s887_s6 = int_to_ptr.vmem [resolvable:$true] %s322_s6 }
  0x5f   : > { %s235_s18 = scalar_lea.vmem %s936_s2, %s234_s21  ;;  %s307_s7 = scalar_lea.sflag [#allocation4], %s867_s8 }
  0x60   : > { %450 = vmatpush3.bf16.msra.mxu0 %v534_v2  ;;  %v436_v4 = vld [vmem:[%s235_s18] ss:$0 sm:$0xff]  ;;  %s593_s15 = scalar_lea.vmem %s887_s6, 128  ;;  %p958_p11 = scmp.ne.s32.totalorder %s947_s24, 0 }
  0x61   : > { %p594_p10 = scmp.ne.s32.totalorder %s887_s6, %s593_s15  ;;  %s688_s9 = smov [#allocation7]  }
  0x62   : > { %s597_s10 = sshll.u32 %s688_s9, 4  ;;  %s598_s10 = int_to_ptr.vmem [resolvable:$false] %s597_s10 }
  0x63   : > { %452 = vmatmul.mubr.msk.bf16.vlgmr.msra.gmra.mrb[0].mxu0 %vm261_vm1, %v237_v3  ;;  %p595_p1 = pnand %p594_p10, %p958_p11  ;;  %s599_s30 = scalar_lea.vmem %s598_s10, 256 }
  0x64   : > { %p600_p9 = scmp.lt.s32.totalorder %s887_s6, %s598_s10  ;;  %p601_p3 = scmp.lt.s32.totalorder %s599_s30, %s593_s15 }
  0x65   : > { %p596_p0 = pneg %p595_p1 }
  0x66   : > { %p602_p7 = por %p601_p3, %p600_p9 }
  0x68   : > { %p603_p13 = pnand %p602_p7, %p596_p0 }
 0x136   : > { %v299_v5 = vpop.f32.mrb[0].mxu0 }
 0x137   : > { %v300_v6 = vadd.f32 %v436_v4, %v299_v5  ;;  %v453_v7 = vpop.f32.mrb[1].mxu0 }
 0x138   : > { %v302_v8 = vpop.f32.mrb[2].mxu0 }
 0x139   : > { %305 = vst [vmem:[%s232_s5] sm:$0xff] %v300_v6  ;;  %v454_v9 = vpop.f32.mrb[3].mxu0 }
 0x13a   : > { %606 = shalt.err (!%p603_p13)
}
 0x13b   : > { %s607_s8 = scalar_lea.hbm %s885_s27, 128  ;;  %s611_s23 = scalar_lea.hbm %s937_s3, 256 }
 0x13c   : > { %p608_p2 = scmp.ne.s32.totalorder %s885_s27, %s607_s8  ;;  %p612_p4 = scmp.lt.u32.totalorder %s885_s27, %s937_s3 }
 0x13d   : > { %p613_p5 = scmp.lt.u32.totalorder %s611_s23, %s607_s8  ;;  %p615_p10 = scmp.lt.u32.totalorder %s607_s8, %s885_s27 }
 0x13e   : > { %p609_p6 = pnand %p608_p2, %p958_p11 }
 0x13f   : > { %p614_p8 = por %p613_p5, %p612_p4 }
 0x140   : > { %p610_p12 = pneg %p609_p6 }
 0x141   : > { %p616_p1 = por %p615_p10, %p614_p8 }
 0x143   : > { %p617_p0 = pnand %p616_p1, %p610_p12 }
 0x145   : > { %620 = shalt.err (!%p617_p0)
}
 0x146   : > { %461 = dma.vmem_to_hbm [thread:$0]  (%p958_p11), %s887_s6, 128, %s885_s27, %s307_s7  }
 0x147 PF: > { %s334_s18 = sand.u32 1, %s659_s12   ;;  %p959_p9 = scmp.ne.s32.totalorder %s948_s25, 0 }
 0x148   : > { %p960_p3 = scmp.ge.s32.totalorder %s679_s17, 2  ;;  %s335_s22 = scalar_lea.sflag [#allocation4], %s334_s18 }
 0x14a   : > { %p472_p7 = pnand %p960_p3, %p959_p9 }
 0x14c   : > { %654 = dma.done.wait (!%p472_p7), %s335_s22, 128  }
 0x14d   : > { %656 = vsyncadd (!%p472_p7), %s335_s22, 4294967168  ;;  %s20_s17 = sadd.s32 1, %s679_s17   ;;  %s961_s12 = smov %s663_s13 }
 0x14e   : > { %p17_p13 = scmp.ge.s32.totalorder %s20_s17, 4   ;;  %s962_s13 = smov %s667_s14 }
 0x14f   : > { %s963_s14 = smov %s828_s28  ;;  %s964_s15 = smov %s675_s16 }
 0x150   : > { %s965_s16 = smov %s967_s4  ;;  %19 = sbr.rel (!%p17_p13) target bundleno = 7 (0x7), region = 86 }
 0x157   :  { %340 = vsyncpa [#allocation3], 1 }
 0x158   :  { %342 = vsyncpa [#allocation3 + $0x1], 1 }
 0x159   :  { %343 = vsyncpa [#allocation6], 1 }
 0x15a   :  { %345 = vsyncpa [#allocation6 + $0x1], 1 }
 0x15b   :  { %346 = vsyncpa [#allocation4], 1 }
 0x15c   :  { %348 = vsyncpa [#allocation4 + $0x1], 1 }

</bundles_post_ra>
